<compile_context>
chip_gen: v7x
topology: tpu7x:2x2x1
jax: 0.10.0
libtpu: 0.0.40
codegen_flags: <defaults>
</compile_context>

<pallas_src>
import functools

import jax
import jax.numpy as jnp
from jax import lax
from jax.experimental import pallas as pl
from jax.experimental.pallas import tpu as pltpu


_TB_TARGET = 8192   # target rows per grid block (batch tile)
_RC = 256           # rows per inner chunk: intermediates stay at (256, 64)/(256, 32)


def _round_up(n, m):
    return ((n + m - 1) // m) * m


def _choose_tiling(batch, tb_target):
    """Returns (n_blocks, tb, rc). tb is a multiple of rc; padding waste is bounded."""
    if batch <= _RC:
        # Single block covering the whole batch (block dim == full array dim is legal
        # even when not a multiple of 8).  One chunk.
        return 1, batch, batch
    # Balance blocks first (bounds padding waste), and force >= 2 blocks so the
    # "parallel" batch axis can use both TensorCores on megacore parts.
    n_blocks = max(pl.cdiv(batch, tb_target), 2)
    tb = _round_up(pl.cdiv(batch, n_blocks), _RC)
    n_blocks = pl.cdiv(batch, tb)
    return n_blocks, tb, _RC


def _mlp_kernel(x_ref, w1_ref, b1_ref, w2_ref, b2_ref, w3_ref, b3_ref, o_ref, *, rc):
    """x_ref: (tb, 4) batch-major tile; weights pre-transposed to (in, out); biases (1, out)."""
    tb = x_ref.shape[0]
    n_chunks = tb // rc

    # Hoist weight/bias loads out of the chunk loop (VMEM-resident, tiny).
    w1 = w1_ref[...]
    b1 = b1_ref[...]
    w2 = w2_ref[...]
    b2 = b2_ref[...]
    w3 = w3_ref[...]
    b3 = b3_ref[...]

    def chunk(j, carry):
        r0 = j * rc
        if rc % 8 == 0:
            r0 = pl.multiple_of(r0, 8)
        xc = x_ref[pl.ds(r0, rc), :]                                   # (rc, 4)
        h1 = jnp.dot(xc, w1, preferred_element_type=jnp.float32) + b1  # (rc, 64)
        h1 = jnp.maximum(h1, 0.0)
        h2 = jnp.dot(h1, w2, preferred_element_type=jnp.float32) + b2  # (rc, 32)
        h2 = jnp.maximum(h2, 0.0)
        y = jnp.dot(h2, w3, preferred_element_type=jnp.float32) + b3   # (rc, 2)
        o_ref[pl.ds(r0, rc), :] = y.astype(o_ref.dtype)
        return carry

    lax.fori_loop(0, n_chunks, chunk, 0, unroll=min(n_chunks, 8))


@functools.partial(jax.jit, static_argnames=("tb_target",))
def lunge_classifier_forward(x, params, *, tb_target=_TB_TARGET):
    """x: (B, 4) float32 -> (B, 2) float32. params in PyTorch layout ((out,in), (out,))."""
    w1, b1, w2, b2, w3, b3 = params
    batch = x.shape[0]
    n_blocks, tb, rc = _choose_tiling(batch, tb_target)

    # Tiny (few-KiB) weight relayouts so every layer is a plain NN matmul; biases become
    # (1, out) rows that broadcast over the batch (sublane) axis.
    w1t, w2t, w3t = w1.T, w2.T, w3.T
    b1r, b2r, b3r = b1.reshape(1, -1), b2.reshape(1, -1), b3.reshape(1, -1)

    # Weights/biases: full-array blocks with constant index_maps -> VMEM-resident.
    def res(a):
        return pl.BlockSpec(a.shape, lambda i: (0, 0))

    weight_bytes = 4 * (4 * 64 + 64 + 64 * 32 + 32 + 32 * 2 + 2)
    cost = pl.CostEstimate(
        flops=2 * (4 * 64 + 64 * 32 + 32 * 2) * batch,   # 4736 * B
        transcendentals=0,
        bytes_accessed=24 * batch + weight_bytes,        # 16 B/row in + 8 B/row out
    )

    out = pl.pallas_call(
        functools.partial(_mlp_kernel, rc=rc),
        out_shape=jax.ShapeDtypeStruct((batch, 2), jnp.float32),
        grid=(n_blocks,),
        in_specs=[
            pl.BlockSpec((tb, 4), lambda i: (i, 0)),
            res(w1t), res(b1r),
            res(w2t), res(b2r),
            res(w3t), res(b3r),
        ],
        out_specs=pl.BlockSpec((tb, 2), lambda i: (i, 0)),
        compiler_params=pltpu.CompilerParams(
            dimension_semantics=("parallel",),
            vmem_limit_bytes=32 * 1024 * 1024,
        ),
        cost_estimate=cost,
    )(x, w1t, b1r, w2t, b2r, w3t, b3r)
    return out


def init_params(key):
    """Deterministic init mimicking torch.nn.Linear (uniform +/- 1/sqrt(fan_in)).
    Weights in PyTorch (out_features, in_features) layout; biases (out_features,)."""
    dims = [(4, 64), (64, 32), (32, 2)]
    params = []
    for fan_in, fan_out in dims:
        key, kw, kb = jax.random.split(key, 3)
        bound = 1.0 / float(jnp.sqrt(float(fan_in)))
        w = jax.random.uniform(kw, (fan_out, fan_in), jnp.float32, -bound, bound)
        b = jax.random.uniform(kb, (fan_out,), jnp.float32, -bound, bound)
        params += [w, b]
    return tuple(params)


def reference_forward(x, params):
    w1, b1, w2, b2, w3, b3 = params
    h1 = jnp.maximum(x @ w1.T + b1, 0.0)
    h2 = jnp.maximum(h1 @ w2.T + b2, 0.0)
    return h2 @ w3.T + b3


if __name__ == "__main__":
    key = jax.random.PRNGKey(0)
    kx, kp = jax.random.split(key)
    params = init_params(kp)

    # 1) Small batch: a single (8, 4) block, one inner chunk.
    x1 = jax.random.normal(kx, (8, 4), dtype=jnp.float32)
    o1 = jax.block_until_ready(lunge_classifier_forward(x1, params))
    r1 = reference_forward(x1, params)
    assert o1.shape == (8, 2)
    assert jnp.allclose(o1, r1, atol=1e-4, rtol=1e-4), "mismatch vs reference (B=8)"

    # 2) Ragged batch: 2 grid blocks of 256 rows, the last one partial (44 valid rows).
    x2 = jax.random.normal(kx, (300, 4), dtype=jnp.float32)
    o2 = jax.block_until_ready(lunge_classifier_forward(x2, params))
    r2 = reference_forward(x2, params)
    assert o2.shape == (300, 2)
    assert jnp.allclose(o2, r2, atol=1e-4, rtol=1e-4), "mismatch vs reference (B=300)"

    # 3) Forced small tile: 4 grid blocks of 512 rows, 2 inner chunks of 256 rows each.
    x3 = jax.random.normal(kx, (2048, 4), dtype=jnp.float32)
    o3 = jax.block_until_ready(lunge_classifier_forward(x3, params, tb_target=512))
    r3 = reference_forward(x3, params)
    assert o3.shape == (2048, 2)
    assert jnp.allclose(o3, r3, atol=1e-4, rtol=1e-4), "mismatch vs reference (B=2048)"

    print("KERNEL_OK")
</pallas_src>

<mosaic_0001>
module attributes {stable_mosaic.version = 11 : i64} {
  func.func @_mlp_kernel(%arg0: i32, %arg1: memref<8x4xf32, #tpu.memory_space<vmem>>, %arg2: memref<4x64xf32, #tpu.memory_space<vmem>>, %arg3: memref<1x64xf32, #tpu.memory_space<vmem>>, %arg4: memref<64x32xf32, #tpu.memory_space<vmem>>, %arg5: memref<1x32xf32, #tpu.memory_space<vmem>>, %arg6: memref<32x2xf32, #tpu.memory_space<vmem>>, %arg7: memref<1x2xf32, #tpu.memory_space<vmem>>, %arg8: memref<8x2xf32, #tpu.memory_space<vmem>>) attributes {dimension_semantics = [#tpu.dimension_semantics<parallel>], iteration_bounds = array<i64: 1>, scalar_prefetch = 0 : i64, scratch_operands = 0 : i64, tpu.core_type = #tpu.core_type<tc>, window_params = [{transform_indices = @transform_0, window_bounds = array<i64: 8, 4>}, {pipeline_mode = #tpu.pipeline_mode<synchronous>, transform_indices = @transform_1, window_bounds = array<i64: 4, 64>}, {pipeline_mode = #tpu.pipeline_mode<synchronous>, transform_indices = @transform_2, window_bounds = array<i64: 1, 64>}, {pipeline_mode = #tpu.pipeline_mode<synchronous>, transform_indices = @transform_3, window_bounds = array<i64: 64, 32>}, {pipeline_mode = #tpu.pipeline_mode<synchronous>, transform_indices = @transform_4, window_bounds = array<i64: 1, 32>}, {pipeline_mode = #tpu.pipeline_mode<synchronous>, transform_indices = @transform_5, window_bounds = array<i64: 32, 2>}, {pipeline_mode = #tpu.pipeline_mode<synchronous>, transform_indices = @transform_6, window_bounds = array<i64: 1, 2>}, {transform_indices = @transform_7, window_bounds = array<i64: 8, 2>}]} {
    %c0 = arith.constant 0 : index
    %c0_0 = arith.constant 0 : index
    %0 = vector.load %arg2[%c0, %c0_0] : memref<4x64xf32, #tpu.memory_space<vmem>>, vector<4x64xf32>
    %c0_1 = arith.constant 0 : index
    %c0_2 = arith.constant 0 : index
    %1 = vector.load %arg3[%c0_1, %c0_2] : memref<1x64xf32, #tpu.memory_space<vmem>>, vector<1x64xf32>
    %c0_3 = arith.constant 0 : index
    %c0_4 = arith.constant 0 : index
    %2 = vector.load %arg4[%c0_3, %c0_4] : memref<64x32xf32, #tpu.memory_space<vmem>>, vector<64x32xf32>
    %c0_5 = arith.constant 0 : index
    %c0_6 = arith.constant 0 : index
    %3 = vector.load %arg5[%c0_5, %c0_6] : memref<1x32xf32, #tpu.memory_space<vmem>>, vector<1x32xf32>
    %c0_7 = arith.constant 0 : index
    %c0_8 = arith.constant 0 : index
    %4 = vector.load %arg6[%c0_7, %c0_8] : memref<32x2xf32, #tpu.memory_space<vmem>>, vector<32x2xf32>
    %c0_9 = arith.constant 0 : index
    %c0_10 = arith.constant 0 : index
    %5 = vector.load %arg7[%c0_9, %c0_10] : memref<1x2xf32, #tpu.memory_space<vmem>>, vector<1x2xf32>
    %c0_i32 = arith.constant 0 : i32
    %c8_i32 = arith.constant 8 : i32
    %6 = arith.muli %c0_i32, %c8_i32 : i32
    %7 = tpu.assume_multiple %6, 8 : i32
    %8 = arith.index_cast %7 : i32 to index
    %c0_11 = arith.constant 0 : index
    %9 = vector.load %arg1[%8, %c0_11] : memref<8x4xf32, #tpu.memory_space<vmem>>, vector<8x4xf32>
    %cst = arith.constant dense<0.000000e+00> : vector<8x64xf32>
    %10 = tpu.matmul %9, %0, %cst {dimension_numbers = #tpu.dot_dimension_numbers<[1], [0], [0], [1], [0, 0, 1, 1], [], []>} : vector<8x4xf32>, vector<4x64xf32>, vector<8x64xf32> -> vector<8x64xf32>
    %11 = vector.broadcast %1 : vector<1x64xf32> to vector<8x64xf32>
    %12 = arith.addf %10, %11 : vector<8x64xf32>
    %cst_12 = arith.constant 0.000000e+00 : f32
    %13 = vector.broadcast %cst_12 : f32 to vector<8x64xf32>
    %14 = arith.maximumf %12, %13 : vector<8x64xf32>
    %cst_13 = arith.constant dense<0.000000e+00> : vector<8x32xf32>
    %15 = tpu.matmul %14, %2, %cst_13 {dimension_numbers = #tpu.dot_dimension_numbers<[1], [0], [0], [1], [0, 0, 1, 1], [], []>} : vector<8x64xf32>, vector<64x32xf32>, vector<8x32xf32> -> vector<8x32xf32>
    %16 = vector.broadcast %3 : vector<1x32xf32> to vector<8x32xf32>
    %17 = arith.addf %15, %16 : vector<8x32xf32>
    %cst_14 = arith.constant 0.000000e+00 : f32
    %18 = vector.broadcast %cst_14 : f32 to vector<8x32xf32>
    %19 = arith.maximumf %17, %18 : vector<8x32xf32>
    %cst_15 = arith.constant dense<0.000000e+00> : vector<8x2xf32>
    %20 = tpu.matmul %19, %4, %cst_15 {dimension_numbers = #tpu.dot_dimension_numbers<[1], [0], [0], [1], [0, 0, 1, 1], [], []>} : vector<8x32xf32>, vector<32x2xf32>, vector<8x2xf32> -> vector<8x2xf32>
    %21 = vector.broadcast %5 : vector<1x2xf32> to vector<8x2xf32>
    %22 = arith.addf %20, %21 : vector<8x2xf32>
    %23 = arith.index_cast %7 : i32 to index
    %c0_16 = arith.constant 0 : index
    %24 = vector.load %arg8[%23, %c0_16] : memref<8x2xf32, #tpu.memory_space<vmem>>, vector<8x2xf32>
    tpu.vector_store %arg8[%23, %c0_16], %22 {strides = array<i32>} : memref<8x2xf32, #tpu.memory_space<vmem>>, vector<8x2xf32>,
    %c1_i32 = arith.constant 1 : i32
    return
  }
  func.func @transform_0(%arg0: i32) -> (i32, i32) {
    %c0_i32 = arith.constant 0 : i32
    %c0_i32_0 = arith.constant 0 : i32
    return %arg0, %c0_i32 : i32, i32
  }
  func.func @transform_1(%arg0: i32) -> (i32, i32) {
    %c0_i32 = arith.constant 0 : i32
    %c0_i32_0 = arith.constant 0 : i32
    %c0_i32_1 = arith.constant 0 : i32
    return %c0_i32, %c0_i32_0 : i32, i32
  }
  func.func @transform_2(%arg0: i32) -> (i32, i32) {
    %c0_i32 = arith.constant 0 : i32
    %c0_i32_0 = arith.constant 0 : i32
    %c0_i32_1 = arith.constant 0 : i32
    return %c0_i32, %c0_i32_0 : i32, i32
  }
  func.func @transform_3(%arg0: i32) -> (i32, i32) {
    %c0_i32 = arith.constant 0 : i32
    %c0_i32_0 = arith.constant 0 : i32
    %c0_i32_1 = arith.constant 0 : i32
    return %c0_i32, %c0_i32_0 : i32, i32
  }
  func.func @transform_4(%arg0: i32) -> (i32, i32) {
    %c0_i32 = arith.constant 0 : i32
    %c0_i32_0 = arith.constant 0 : i32
    %c0_i32_1 = arith.constant 0 : i32
    return %c0_i32, %c0_i32_0 : i32, i32
  }
  func.func @transform_5(%arg0: i32) -> (i32, i32) {
    %c0_i32 = arith.constant 0 : i32
    %c0_i32_0 = arith.constant 0 : i32
    %c0_i32_1 = arith.constant 0 : i32
    return %c0_i32, %c0_i32_0 : i32, i32
  }
  func.func @transform_6(%arg0: i32) -> (i32, i32) {
    %c0_i32 = arith.constant 0 : i32
    %c0_i32_0 = arith.constant 0 : i32
    %c0_i32_1 = arith.constant 0 : i32
    return %c0_i32, %c0_i32_0 : i32, i32
  }
  func.func @transform_7(%arg0: i32) -> (i32, i32) {
    %c0_i32 = arith.constant 0 : i32
    %c0_i32_0 = arith.constant 0 : i32
    return %arg0, %c0_i32 : i32, i32
  }
}

</mosaic_0001>

<bundles_post_ra>
// kernel: lunge_classifier_forward.1
= control target key start
LH: loop header
LB: loop body
LE: loop exit
PB: predicated region body
PF: predicated region fallthrough
CT: control target
= control target key end

     0   :  { %vm53_vm0 = vcmask 1043456   ;;  %vm49_vm1 = vcmask 31744   ;;  %v374_v0 = vmov 0.0   ;;  %vm375_vm2 = vmmov 0   ;;  %s471_s1 = inlined_call_operand.vmem [shape: f32[4,64], index: 1, kind: input, shape index: {}]   ;;  %s472_s0 = inlined_call_operand.vmem [shape: f32[8,4], index: 0, kind: input, shape index: {}]   ;;  %s473_s3 = inlined_call_operand.vmem [shape: f32[64,32], index: 3, kind: input, shape index: {}]   ;;  %s474_s5 = inlined_call_operand.vmem [shape: f32[32,2], index: 5, kind: input, shape index: {}]   ;;  %s475_s2 = inlined_call_operand.vmem [shape: f32[1,64], index: 2, kind: input, shape index: {}]   ;;  %s476_s4 = inlined_call_operand.vmem [shape: f32[1,32], index: 4, kind: input, shape index: {}]   ;;  %s477_s6 = inlined_call_operand.vmem [shape: f32[1,2], index: 6, kind: input, shape index: {}]   ;;  %s478_s7 = inlined_call_operand.vmem [shape: f32[8,2], index: 7, kind: output, shape index: {}]  }
   0x1   :  { %318 = vmatprep.subr.mxu0 %v374_v0  ;;  %v26_v1 = vld [vmem:[%s471_s1] sm:$0xf]  ;;  %320 = vmatprep.mubr.msk.f32.mxu0 %vm375_vm2, %v374_v0  ;;  %v376_v4 = vmov 0.0|0.0   ;;  %v29_v5 = vld [vmem:[%s473_s3 + $0x8] sm:$0xff]  ;;  %v30_v6 = vld [vmem:[%s473_s3 + $0x10] sm:$0xff]  ;;  %vm134_vm3 = vcmask 523264  }
   0x2   :  { %v42_v2 = vld [vmem:[%s472_s0] sm:$0xff]  ;;  %319 = vmatpush3.msk.msra.mxu0 %vm53_vm0, %v26_v1  ;;  %353 = vmatprep.subr.bf16.mxu1 %v376_v4  ;;  %v31_v7 = vld [vmem:[%s473_s3 + $0x18] sm:$0xff]  ;;  %v33_v11 = vld [vmem:[%s473_s3 + $0x28] sm:$0xff]  ;;  %vm215_vm4 = vcmask 261120   ;;  %vm289_vm5 = vcmask 15360  }
   0x3   :  { %v28_v3 = vld [vmem:[%s473_s3] sm:$0xff]  ;;  %321 = vmatmul.mubr.msk.f32.vlgmr.msra.gmra.mrb[0].mxu0 %vm49_vm1, %v42_v2  ;;  %339 = vmatprep.mubr.msk.f32.mxu1 %vm375_vm2, %v374_v0  ;;  %v357_v9 = vpack.c.bf16 %v31_v7, %v30_v6  ;;  %v34_v13 = vld [vmem:[%s473_s3 + $0x30] sm:$0xff]  ;;  %v35_v14 = vld [vmem:[%s473_s3 + $0x38] sm:$0xff] }
   0x4   :  { %v354_v8 = vpack.c.bf16 %v29_v5, %v28_v3  ;;  %365 = vmatprep.subr.bf16.mxu0 %v376_v4  ;;  %350 = vmatprep.mubr.msk.f32.mxu0 %vm375_vm2, %v374_v0  ;;  %v32_v10 = vld [vmem:[%s473_s3 + $0x20] sm:$0xff]  ;;  %v363_v15 = vpack.c.bf16 %v35_v14, %v34_v13  ;;  %v38_v17 = vld [vmem:[%s474_s5 + $0x8] sm:$0xff]  ;;  %v39_v24 = vld [vmem:[%s474_s5 + $0x10] sm:$0xff] }
   0x5   :  { %v360_v12 = vpack.c.bf16 %v33_v11, %v32_v10  ;;  %v37_v16 = vld [vmem:[%s474_s5] sm:$0xff]  ;;  %v40_v25 = vld [vmem:[%s474_s5 + $0x18] sm:$0xff] }
   0x6   :  { %355 = vmatpush3.bf16.msra.mxu1 %v354_v8  ;;  %v366_v18 = vpack.c.bf16 %v38_v17, %v37_v16  ;;  %v295_v19 = vld [vmem:[%s475_s2] ss:$0 sm:$0xff]  ;;  %v369_v26 = vpack.c.bf16 %v40_v25, %v39_v24 }
   0x7   :  { %356 = vmatprep.subr.bf16.mxu1 %v376_v4  ;;  %v298_v27 = vld [vmem:[%s476_s4] ss:$0 sm:$0xff] }
   0x8   :  { %367 = vmatpush3.bf16.msra.mxu0 %v366_v18  ;;  %v300_v32 = vld [vmem:[%s477_s6] ss:$0 sm:$0xff] }
   0x9   :  { %368 = vmatprep.subr.bf16.mxu0 %v376_v4 }
   0xa   :  { %358 = vmatpush3.bf16.msra.mxu1 %v357_v9 }
   0xb   :  { %359 = vmatprep.subr.bf16.mxu1 %v376_v4 }
   0xc   :  { %370 = vmatpush3.bf16.msra.mxu0 %v369_v26 }
   0xe   :  { %361 = vmatpush3.bf16.msra.mxu1 %v360_v12 }
   0xf   :  { %362 = vmatprep.subr.bf16.mxu1 %v376_v4 }
  0x12   :  { %364 = vmatpush3.bf16.msra.mxu1 %v363_v15 }
  0xd6   :  { %v123_v20 = vpop.f32.mrb[0].mxu0 }
  0xd7   :  { %v124_v21 = vadd.f32 %v295_v19, %v123_v20  ;;  %v322_v22 = vpop.f32.mrb[1].mxu0 }
  0xd9   :  { %v127_v23 = vmax.f32 %v124_v21, 0.0 }
  0xdb   :  { %340 = vmatmul.mubr.msk.f32.vlgmr.msra.gmra.mrb[0].mxu1 %vm134_vm3, %v127_v23 }
 0x1ae   :  { %v204_v28 = vpop.f32.mrb[0].mxu1 }
 0x1af   :  { %v205_v29 = vadd.f32 %v298_v27, %v204_v28  ;;  %v341_v30 = vpop.f32.mrb[1].mxu1 }
 0x1b1   :  { %v208_v31 = vmax.f32 %v205_v29, 0.0 }
 0x1b3   :  { %351 = vmatmul.mubr.msk.f32.vlgmr.msra.gmra.mrb[2].mxu0 %vm215_vm4, %v208_v31 }
 0x286   :  { %v285_v33 = vpop.f32.mrb[2].mxu0 }
 0x287   :  { %v286_v34 = vadd.f32 %v300_v32, %v285_v33  ;;  %v352_v35 = vpop.f32.mrb[3].mxu0 }
 0x289   :  { %290 = vst.msk [vmem:[%s478_s7] sm:$0xff] %vm289_vm5, %v286_v34 }

</bundles_post_ra>
